<compile_context>
chip_gen: v7x
topology: tpu7x:2x2x1
jax: 0.10.0
libtpu: 0.0.40
codegen_flags: <defaults>
</compile_context>

<pallas_src>
import jax
import jax.numpy as jnp
from jax.experimental import pallas as pl
from jax.experimental.pallas import tpu as pltpu

_COMPILER_SCRATCH = 4 * 1024 * 1024  # allowance for Mosaic-internal scratch
_DEFAULT_VMEM_LIMIT = 32 * 1024 * 1024


def _round_up(x, m):
    return ((x + m - 1) // m) * m


def _spec(shape, index_map, *, single_buffer=False):
    """BlockSpec helper; single_buffer marks grid-constant (resident) operands."""
    if single_buffer:
        try:
            return pl.BlockSpec(shape, index_map, pipeline_mode=pl.Buffered(1))
        except (TypeError, ValueError):
            pass  # older API without pipeline_mode: default double-buffering
    return pl.BlockSpec(shape, index_map)


def _vmem_ceiling_bytes():
    """Generation-aware scoped-VMEM ceiling (capacity minus ~12.5% headroom)."""
    cap = 64 * 1024 * 1024  # conservative default: v7x per-TensorCore VMEM
    try:
        cap = int(pltpu.get_tpu_info().vmem_capacity_bytes)
    except Exception:
        pass
    return cap - cap // 8


# --------------------------------------------------------------------------
# Kernels
# --------------------------------------------------------------------------
def _mlp_kernel_resident(x_ref, w1_ref, b1_ref, w2_ref, b2_ref, o_ref):
    # In-kernel cast of x to the compute dtype (hides under the MXU).
    x = x_ref[...].astype(w1_ref.dtype)
    h = jnp.dot(x, w1_ref[...], preferred_element_type=jnp.float32)
    h = jnp.maximum(h + b1_ref[...], 0.0)  # bias + ReLU epilogue (f32, VPU)
    # Dropout(p) in eval/inference mode == identity.
    out = jnp.dot(h.astype(w2_ref.dtype), w2_ref[...],
                  preferred_element_type=jnp.float32)
    o_ref[...] = (out + b2_ref[...]).astype(o_ref.dtype)


def _mlp_kernel_hidden_tiled(x_ref, w1_ref, b1_ref, w2_ref, b2_ref, o_ref,
                             acc_ref):
    k = pl.program_id(1)

    @pl.when(k == 0)
    def _():
        acc_ref[...] = jnp.zeros_like(acc_ref)

    x = x_ref[...].astype(w1_ref.dtype)
    h = jnp.dot(x, w1_ref[...], preferred_element_type=jnp.float32)
    h = jnp.maximum(h + b1_ref[...], 0.0)
    acc_ref[...] += jnp.dot(h.astype(w2_ref.dtype), w2_ref[...],
                            preferred_element_type=jnp.float32)

    @pl.when(k == pl.num_programs(1) - 1)
    def _():
        o_ref[...] = (acc_ref[...] + b2_ref[...]).astype(o_ref.dtype)


# --------------------------------------------------------------------------
# Wrappers
# --------------------------------------------------------------------------
def prepare_mlp_params(w1, b1, w2, b2, *, compute_dtype=jnp.bfloat16):
    """Pad feature dims to the 128-lane grain and cast weights ONCE (hoisted
    out of the per-call path for this weight-stationary kernel).  Skips the
    pad/cast entirely when already aligned and in the compute dtype."""
    in_dim, hidden = w1.shape
    out_dim = w2.shape[1]
    in_p = _round_up(in_dim, 128)
    hid_p = _round_up(hidden, 128)
    out_p = _round_up(out_dim, 128)
    cdt = compute_dtype
    b1 = jnp.reshape(b1, (1, hidden))
    b2 = jnp.reshape(b2, (1, out_dim))

    def pad2(a, shape, dtype):
        if a.shape == shape and a.dtype == dtype:
            return a
        return jnp.zeros(shape, dtype).at[:a.shape[0], :a.shape[1]].set(
            a.astype(dtype))

    return dict(
        w1=pad2(w1, (in_p, hid_p), cdt),
        b1=pad2(b1, (1, hid_p), jnp.float32),
        w2=pad2(w2, (hid_p, out_p), cdt),
        b2=pad2(b2, (1, out_p), jnp.float32),
        dims=(in_dim, hidden, out_dim),
    )


def mlp_forward_padded(x, params, *, block_m=256, out_dtype=None,
                       max_hidden_block=512, force_hidden_tiling=False):
    """x: (B, in_dim); params: from prepare_mlp_params.  Returns (B, out_dim)."""
    w1p, b1p, w2p, b2p = params["w1"], params["b1"], params["w2"], params["b2"]
    in_dim, hidden, out_dim = params["dims"]
    B = x.shape[0]
    assert x.shape[1] == in_dim
    in_p, hid_p = w1p.shape
    out_p = w2p.shape[1]
    cdt = w1p.dtype
    out_dtype = x.dtype if out_dtype is None else out_dtype

    c_item = jnp.dtype(cdt).itemsize
    x_item = jnp.dtype(x.dtype).itemsize
    o_item = jnp.dtype(out_dtype).itemsize

    # --- batch tile selection ---------------------------------------------
    tm = _round_up(min(block_m, _round_up(B, 16)), 16)  # 16: bf16 sublane pack
    if tm >= 128:
        tm = (tm // 128) * 128                          # MXU-pass friendly
    # Megacore (v7x): ensure >= 2 batch tiles when the batch permits.
    if B >= 256 and _round_up(B, tm) // tm < 2:
        tm = min(tm, _round_up((B + 1) // 2, 128))
    b_p = _round_up(B, tm)
    grid_m = b_p // tm

    # --- pad x only when needed ---------------------------------------------
    if (b_p, in_p) != (B, in_dim):
        xp = jnp.zeros((b_p, in_p), x.dtype).at[:B, :in_dim].set(x)
    else:
        xp = x

    vmem_ceiling = _vmem_ceiling_bytes()

    # --- tight VMEM budget for the resident-weight path ---------------------
    resident_bytes = ((w1p.size + w2p.size) * c_item        # single-buffered
                      + (b1p.size + b2p.size) * 4)
    tile_bytes = (2 * tm * in_p * x_item                     # x tile (dbl buf)
                  + 2 * tm * out_p * o_item                  # out tile (dbl buf)
                  + tm * hid_p * (4 + c_item)                # f32 h + bf16 copy
                  + tm * out_p * 4)                          # f32 out pre-cast
    resident_total = resident_bytes + tile_bytes + _COMPILER_SCRATCH
    use_resident = (not force_hidden_tiling) and resident_total <= vmem_ceiling

    flops = 2 * b_p * (in_p * hid_p + hid_p * out_p)
    bytes_accessed = (xp.size * x_item + (w1p.size + w2p.size) * c_item
                      + (b1p.size + b2p.size) * 4 + b_p * out_p * o_item)
    cost = pl.CostEstimate(flops=flops, transcendentals=0,
                           bytes_accessed=bytes_accessed)

    if use_resident:
        vmem_limit = int(min(max(resident_total, _DEFAULT_VMEM_LIMIT),
                             vmem_ceiling))
        out_padded = pl.pallas_call(
            _mlp_kernel_resident,
            out_shape=jax.ShapeDtypeStruct((b_p, out_p), out_dtype),
            grid_spec=pltpu.PrefetchScalarGridSpec(
                num_scalar_prefetch=0,
                grid=(grid_m,),
                in_specs=[
                    _spec((tm, in_p), lambda i: (i, 0)),             # streamed x
                    _spec((in_p, hid_p), lambda i: (0, 0), single_buffer=True),
                    _spec((1, hid_p), lambda i: (0, 0), single_buffer=True),
                    _spec((hid_p, out_p), lambda i: (0, 0), single_buffer=True),
                    _spec((1, out_p), lambda i: (0, 0), single_buffer=True),
                ],
                out_specs=pl.BlockSpec((tm, out_p), lambda i: (i, 0)),
            ),
            compiler_params=pltpu.CompilerParams(
                dimension_semantics=("parallel",),
                vmem_limit_bytes=vmem_limit,
            ),
            cost_estimate=cost,
        )(xp, w1p, b1p, w2p, b2p)
    else:
        # Fallback for weights too large to stay resident (e.g. v7x 64 MiB
        # per-TC VMEM): stream hidden-dim slabs of w1/b1/w2 and accumulate the
        # second matmul in an f32 scratch across the "arbitrary" grid axis.
        tkh = min(_round_up(min(max_hidden_block, hid_p), 128), hid_p)

        def tiled_bytes(tk):
            return (2 * (in_p * tk + tk * out_p) * c_item    # w1/w2 slabs (dbl)
                    + 2 * tk * 4 + out_p * 4                 # b1 slabs + b2
                    + 2 * tm * in_p * x_item                 # x tile
                    + 2 * tm * out_p * o_item                # out tile
                    + tm * out_p * 4                         # acc scratch
                    + tm * tk * (4 + c_item)                 # h intermediates
                    + tm * out_p * 4                         # f32 out pre-cast
                    + _COMPILER_SCRATCH)

        while tkh > 128 and tiled_bytes(tkh) > vmem_ceiling:
            tkh -= 128

        hid_pp = _round_up(hid_p, tkh)
        if hid_pp != hid_p:  # repad so hidden splits evenly into tkh slabs
            w1p = jnp.zeros((in_p, hid_pp), cdt).at[:, :hid_p].set(w1p)
            b1p = jnp.zeros((1, hid_pp), jnp.float32).at[:, :hid_p].set(b1p)
            w2p = jnp.zeros((hid_pp, out_p), cdt).at[:hid_p, :].set(w2p)
            hid_p = hid_pp
        grid_k = hid_p // tkh

        vmem_limit = int(min(max(tiled_bytes(tkh), _DEFAULT_VMEM_LIMIT),
                             vmem_ceiling))
        out_padded = pl.pallas_call(
            _mlp_kernel_hidden_tiled,
            out_shape=jax.ShapeDtypeStruct((b_p, out_p), out_dtype),
            grid_spec=pltpu.PrefetchScalarGridSpec(
                num_scalar_prefetch=0,
                grid=(grid_m, grid_k),
                in_specs=[
                    _spec((tm, in_p), lambda i, k: (i, 0)),
                    _spec((in_p, tkh), lambda i, k: (0, k)),
                    _spec((1, tkh), lambda i, k: (0, k)),
                    _spec((tkh, out_p), lambda i, k: (k, 0)),
                    _spec((1, out_p), lambda i, k: (0, 0), single_buffer=True),
                ],
                out_specs=pl.BlockSpec((tm, out_p), lambda i, k: (i, 0)),
                scratch_shapes=[pltpu.VMEM((tm, out_p), jnp.float32)],
            ),
            compiler_params=pltpu.CompilerParams(
                dimension_semantics=("parallel", "arbitrary"),
                vmem_limit_bytes=vmem_limit,
            ),
            cost_estimate=cost,
        )(xp, w1p, b1p, w2p, b2p)

    if (b_p, out_p) != (B, out_dim):
        out_padded = out_padded[:B, :out_dim]
    return out_padded


def mlp_forward(x, w1, b1, w2, b2, *, block_m=256, compute_dtype=jnp.bfloat16,
                out_dtype=None, **kwargs):
    """Convenience wrapper (prefer prepare_mlp_params + mlp_forward_padded so
    the weight pad/cast is hoisted out of the per-call path)."""
    params = prepare_mlp_params(w1, b1, w2, b2, compute_dtype=compute_dtype)
    return mlp_forward_padded(x, params, block_m=block_m, out_dtype=out_dtype,
                              **kwargs)


def init_mlp_params(key, in_dim, hidden_dim, out_dim, dtype=jnp.float32):
    """Deterministic init mimicking nn.Linear defaults (uniform +/- 1/sqrt(fan_in)).
    Weights are returned already transposed to (in, out) layout."""
    k1, k2, k3, k4 = jax.random.split(key, 4)
    bound1 = 1.0 / (in_dim ** 0.5)
    bound2 = 1.0 / (hidden_dim ** 0.5)
    w1 = jax.random.uniform(k1, (in_dim, hidden_dim), dtype, -bound1, bound1)
    b1 = jax.random.uniform(k2, (1, hidden_dim), dtype, -bound1, bound1)
    w2 = jax.random.uniform(k3, (hidden_dim, out_dim), dtype, -bound2, bound2)
    b2 = jax.random.uniform(k4, (1, out_dim), dtype, -bound2, bound2)
    return w1, b1, w2, b2


if __name__ == "__main__":
    key = jax.random.PRNGKey(0)
    kx, kp, kx2, kp2 = jax.random.split(key, 4)

    def ref_mixed(x, w1, b1, w2, b2):
        # Same mixed-precision recipe as the kernel (bf16 operands, f32 accum,
        # bf16 recast of the hidden activation).
        f32 = jnp.float32
        xb = x.astype(jnp.bfloat16).astype(f32)
        w1b = w1.astype(jnp.bfloat16).astype(f32)
        w2b = w2.astype(jnp.bfloat16).astype(f32)
        h = jnp.maximum(jnp.dot(xb, w1b, precision="highest") + b1, 0.0)
        h = h.astype(jnp.bfloat16).astype(f32)
        return jnp.dot(h, w2b, precision="highest") + b2

    # --- small shapes consistent with the module (resident-weight path) -----
    batch, in_dim, hidden_dim, out_dim = 8, 16, 32, 8
    x = jax.random.normal(kx, (batch, in_dim), dtype=jnp.float32)
    w1, b1, w2, b2 = init_mlp_params(kp, in_dim, hidden_dim, out_dim)

    params = prepare_mlp_params(w1, b1, w2, b2)   # hoisted weight pad/cast
    out = mlp_forward_padded(x, params)
    jax.block_until_ready(out)
    assert out.shape == (batch, out_dim)

    ref = ref_mixed(x, w1, b1, w2, b2)
    assert jnp.allclose(out, ref, atol=2e-2, rtol=2e-2)
    # Loose sanity check against the pure-f32 math of the original module.
    ref_f32 = jnp.maximum(x @ w1 + b1, 0.0) @ w2 + b2
    assert jnp.allclose(out, ref_f32, atol=5e-2, rtol=5e-2)

    # --- exercise the hidden-dim-tiled fallback path (multi-slab accumulate) -
    batch2, in2, hid2, out2 = 32, 64, 384, 48
    x2 = jax.random.normal(kx2, (batch2, in2), dtype=jnp.float32)
    w1c, b1c, w2c, b2c = init_mlp_params(kp2, in2, hid2, out2)
    params2 = prepare_mlp_params(w1c, b1c, w2c, b2c)
    out2a = mlp_forward_padded(x2, params2)                         # resident
    out2b = mlp_forward_padded(x2, params2, force_hidden_tiling=True,
                               max_hidden_block=128)                # tiled (3 slabs)
    jax.block_until_ready((out2a, out2b))
    assert out2b.shape == (batch2, out2)
    assert jnp.allclose(out2a, out2b, atol=2e-2, rtol=2e-2)
    ref2 = ref_mixed(x2, w1c, b1c, w2c, b2c)
    assert jnp.allclose(out2b, ref2, atol=3e-2, rtol=3e-2)

    print("KERNEL_OK")
</pallas_src>

<mosaic_0001>
module attributes {stable_mosaic.version = 11 : i64} {
  func.func @_mlp_kernel_resident(%arg0: i32, %arg1: memref<16x128xf32, #tpu.memory_space<vmem>>, %arg2: memref<128x128xbf16, #tpu.memory_space<vmem>>, %arg3: memref<1x128xf32, #tpu.memory_space<vmem>>, %arg4: memref<128x128xbf16, #tpu.memory_space<vmem>>, %arg5: memref<1x128xf32, #tpu.memory_space<vmem>>, %arg6: memref<16x128xf32, #tpu.memory_space<vmem>>) attributes {dimension_semantics = [#tpu.dimension_semantics<parallel>], iteration_bounds = array<i64: 1>, scalar_prefetch = 0 : i64, scratch_operands = 0 : i64, tpu.core_type = #tpu.core_type<tc>, window_params = [{transform_indices = @transform_0, window_bounds = array<i64: 16, 128>}, {pipeline_mode = #tpu.pipeline_mode<synchronous>, transform_indices = @transform_1, window_bounds = array<i64: 128, 128>}, {pipeline_mode = #tpu.pipeline_mode<synchronous>, transform_indices = @transform_2, window_bounds = array<i64: 1, 128>}, {pipeline_mode = #tpu.pipeline_mode<synchronous>, transform_indices = @transform_3, window_bounds = array<i64: 128, 128>}, {pipeline_mode = #tpu.pipeline_mode<synchronous>, transform_indices = @transform_4, window_bounds = array<i64: 1, 128>}, {transform_indices = @transform_5, window_bounds = array<i64: 16, 128>}]} {
    %c0 = arith.constant 0 : index
    %c0_0 = arith.constant 0 : index
    %0 = vector.load %arg1[%c0, %c0_0] : memref<16x128xf32, #tpu.memory_space<vmem>>, vector<16x128xf32>
    %1 = arith.truncf %0 : vector<16x128xf32> to vector<16x128xbf16>
    %c0_1 = arith.constant 0 : index
    %c0_2 = arith.constant 0 : index
    %2 = vector.load %arg2[%c0_1, %c0_2] : memref<128x128xbf16, #tpu.memory_space<vmem>>, vector<128x128xbf16>
    %cst = arith.constant dense<0.000000e+00> : vector<16x128xf32>
    %3 = tpu.matmul %1, %2, %cst {dimension_numbers = #tpu.dot_dimension_numbers<[1], [0], [0], [1], [0, 0, 1, 1], [], []>} : vector<16x128xbf16>, vector<128x128xbf16>, vector<16x128xf32> -> vector<16x128xf32>
    %c0_3 = arith.constant 0 : index
    %c0_4 = arith.constant 0 : index
    %4 = vector.load %arg3[%c0_3, %c0_4] : memref<1x128xf32, #tpu.memory_space<vmem>>, vector<1x128xf32>
    %5 = vector.broadcast %4 : vector<1x128xf32> to vector<16x128xf32>
    %6 = arith.addf %3, %5 : vector<16x128xf32>
    %cst_5 = arith.constant 0.000000e+00 : f32
    %7 = vector.broadcast %cst_5 : f32 to vector<16x128xf32>
    %8 = arith.maximumf %6, %7 : vector<16x128xf32>
    %9 = arith.truncf %8 : vector<16x128xf32> to vector<16x128xbf16>
    %c0_6 = arith.constant 0 : index
    %c0_7 = arith.constant 0 : index
    %10 = vector.load %arg4[%c0_6, %c0_7] : memref<128x128xbf16, #tpu.memory_space<vmem>>, vector<128x128xbf16>
    %cst_8 = arith.constant dense<0.000000e+00> : vector<16x128xf32>
    %11 = tpu.matmul %9, %10, %cst_8 {dimension_numbers = #tpu.dot_dimension_numbers<[1], [0], [0], [1], [0, 0, 1, 1], [], []>} : vector<16x128xbf16>, vector<128x128xbf16>, vector<16x128xf32> -> vector<16x128xf32>
    %c0_9 = arith.constant 0 : index
    %c0_10 = arith.constant 0 : index
    %12 = vector.load %arg5[%c0_9, %c0_10] : memref<1x128xf32, #tpu.memory_space<vmem>>, vector<1x128xf32>
    %13 = vector.broadcast %12 : vector<1x128xf32> to vector<16x128xf32>
    %14 = arith.addf %11, %13 : vector<16x128xf32>
    %c0_11 = arith.constant 0 : index
    %c0_12 = arith.constant 0 : index
    %15 = vector.load %arg6[%c0_11, %c0_12] : memref<16x128xf32, #tpu.memory_space<vmem>>, vector<16x128xf32>
    tpu.vector_store %arg6[%c0_11, %c0_12], %14 {strides = array<i32>} : memref<16x128xf32, #tpu.memory_space<vmem>>, vector<16x128xf32>,
    return
  }
  func.func @transform_0(%arg0: i32) -> (i32, i32) {
    %c0_i32 = arith.constant 0 : i32
    %c0_i32_0 = arith.constant 0 : i32
    return %arg0, %c0_i32 : i32, i32
  }
  func.func @transform_1(%arg0: i32) -> (i32, i32) {
    %c0_i32 = arith.constant 0 : i32
    %c0_i32_0 = arith.constant 0 : i32
    %c0_i32_1 = arith.constant 0 : i32
    return %c0_i32, %c0_i32_0 : i32, i32
  }
  func.func @transform_2(%arg0: i32) -> (i32, i32) {
    %c0_i32 = arith.constant 0 : i32
    %c0_i32_0 = arith.constant 0 : i32
    %c0_i32_1 = arith.constant 0 : i32
    return %c0_i32, %c0_i32_0 : i32, i32
  }
  func.func @transform_3(%arg0: i32) -> (i32, i32) {
    %c0_i32 = arith.constant 0 : i32
    %c0_i32_0 = arith.constant 0 : i32
    %c0_i32_1 = arith.constant 0 : i32
    return %c0_i32, %c0_i32_0 : i32, i32
  }
  func.func @transform_4(%arg0: i32) -> (i32, i32) {
    %c0_i32 = arith.constant 0 : i32
    %c0_i32_0 = arith.constant 0 : i32
    %c0_i32_1 = arith.constant 0 : i32
    return %c0_i32, %c0_i32_0 : i32, i32
  }
  func.func @transform_5(%arg0: i32) -> (i32, i32) {
    %c0_i32 = arith.constant 0 : i32
    %c0_i32_0 = arith.constant 0 : i32
    return %arg0, %c0_i32 : i32, i32
  }
}

</mosaic_0001>

<bundles_post_ra>
// kernel: tpu_custom_call.1
= control target key start
LH: loop header
LB: loop body
LE: loop exit
PB: predicated region body
PF: predicated region fallthrough
CT: control target
= control target key end

     0   :  { %10 = vsyncpa [#allocation3], 0  ;;  %s615_s0 = inlined_call_operand.hbm [shape: f32[16,128], index: 0, kind: input, shape index: {}]   ;;  %s616_s1 = inlined_call_operand.hbm [shape: bf16[128,128], index: 1, kind: input, shape index: {}]   ;;  %s617_s2 = inlined_call_operand.vmem [shape: f32[1,128], index: 2, kind: input, shape index: {}]   ;;  %s618_s3 = inlined_call_operand.hbm [shape: bf16[128,128], index: 3, kind: input, shape index: {}]   ;;  %s619_s4 = inlined_call_operand.vmem [shape: f32[1,128], index: 4, kind: input, shape index: {}]   ;;  %s620_s5 = inlined_call_operand.hbm [shape: f32[16,128], index: 5, kind: output, shape index: {}]  }
   0x1   :  { %11 = vsyncpa [#allocation6], 0 }
   0x2   :  { %12 = vsyncpa [#allocation4], 0  ;;  %s509_s18 = smov [#allocation5]   ;;  %s415_s22 = scalar_lea.hbm %s616_s1, 1024 }
   0x3   :  { %s30_s19 = sshll.u32 %s509_s18, 4  ;;  %p416_p0 = scmp.ne.s32.totalorder %s616_s1, %s415_s22  ;;  %s31_s19 = int_to_ptr.vmem [resolvable:$true] %s30_s19 }
   0x4   :  { %p419_p1 = scmp.lt.u32.totalorder %s415_s22, %s616_s1 }
   0x6   :  { %p421_p2 = pnand %p419_p1, %p416_p0 }
   0x8   :  { %424 = shalt.err (!%p421_p2)
}
   0x9   :  { %s425_s27 = scalar_lea.vmem %s31_s19, 1024  ;;  %p430_p4 = scmp.lt.s32.totalorder %s31_s19, %s31_s19 }
   0xa   :  { %p426_p3 = scmp.ne.s32.totalorder %s31_s19, %s425_s27  ;;  %p431_p5 = scmp.lt.s32.totalorder %s425_s27, %s425_s27 }
   0xc   :  { %p432_p6 = por %p431_p5, %p430_p4 }
   0xe   :  { %p433_p7 = pnand %p432_p6, %p426_p3 }
  0x10   :  { %436 = shalt.err (!%p433_p7)
}
  0x11   :  { %s510_s28 = smov 64   ;;  %s511_s29 = smov 4  }
  0x12   :  { %36 = dma.hbm_to_vmem [thread:$0]  %s616_s1, 1024, %s31_s19, [#allocation6], %s510_s28, %s510_s28, %s511_s29  }
  0x13   :  { %s512_s7 = smov [#allocation2]   ;;  %s437_s11 = scalar_lea.hbm %s615_s0, 256 }
  0x14   :  { %s18_s8 = sshll.u32 %s512_s7, 4  ;;  %p438_p8 = scmp.ne.s32.totalorder %s615_s0, %s437_s11  ;;  %s19_s8 = int_to_ptr.vmem [resolvable:$true] %s18_s8 }
  0x15   :  { %p441_p9 = scmp.lt.u32.totalorder %s437_s11, %s615_s0 }
  0x17   :  { %p443_p10 = pnand %p441_p9, %p438_p8 }
  0x19   :  { %446 = shalt.err (!%p443_p10)
}
  0x1a   :  { %s447_s16 = scalar_lea.vmem %s19_s8, 256  ;;  %p452_p12 = scmp.lt.s32.totalorder %s19_s8, %s19_s8 }
  0x1b   :  { %p448_p11 = scmp.ne.s32.totalorder %s19_s8, %s447_s16  ;;  %p453_p13 = scmp.lt.s32.totalorder %s447_s16, %s447_s16 }
  0x1d   :  { %p454_p0 = por %p453_p13, %p452_p12 }
  0x1f   :  { %p455_p1 = pnand %p454_p0, %p448_p11 }
  0x21   :  { %458 = shalt.err (!%p455_p1)
}
  0x22   :  { %s513_s1 = smov 128   ;;  %s514_s17 = smov 8  }
  0x23   :  { %24 = dma.hbm_to_vmem [thread:$0]  %s615_s0, 256, %s19_s8, [#allocation3], %s513_s1, %s513_s1, %s514_s17  }
  0x24   :  { %s515_s20 = smov [#allocation7]   ;;  %s459_s24 = scalar_lea.hbm %s618_s3, 1024 }
  0x25   :  { %s44_s21 = sshll.u32 %s515_s20, 4  ;;  %p460_p2 = scmp.ne.s32.totalorder %s618_s3, %s459_s24  ;;  %s45_s21 = int_to_ptr.vmem [resolvable:$true] %s44_s21 }
  0x26   :  { %p463_p3 = scmp.lt.u32.totalorder %s459_s24, %s618_s3 }
  0x28   :  { %p465_p4 = pnand %p463_p3, %p460_p2 }
  0x2a   :  { %468 = shalt.err (!%p465_p4)
}
  0x2b   :  { %s469_s6 = scalar_lea.vmem %s45_s21, 1024  ;;  %p474_p6 = scmp.lt.s32.totalorder %s45_s21, %s45_s21 }
  0x2c   :  { %p470_p5 = scmp.ne.s32.totalorder %s45_s21, %s469_s6  ;;  %p475_p7 = scmp.lt.s32.totalorder %s469_s6, %s469_s6 }
  0x2e   :  { %p476_p8 = por %p475_p7, %p474_p6 }
  0x30   :  { %p477_p9 = pnand %p476_p8, %p470_p5 }
  0x32   :  { %480 = shalt.err (!%p477_p9)
}
  0x33   :  { %50 = dma.hbm_to_vmem [thread:$0]  %s618_s3, 1024, %s45_s21, [#allocation6], %s510_s28, %s510_s28, %s511_s29  }
  0x34   :  { %503 = dma.done.wait [#allocation3], 256  }
  0x35   :  { %504 = vsyncadd [#allocation3], 4294967040 }
  0x36   :  { %505 = dma.done.wait [#allocation6], 2048  }
  0x37   :  { %506 = vsyncadd [#allocation6], 4294965248  ;;  %v516_v0 = vmov 0.0   ;;  %vm517_vm0 = vmmov 0   ;;  %v399_v1 = vld [vmem:[#allocation5] sm:$0xff]   ;;  %v400_v2 = vld [vmem:[#allocation5 + $0x8] sm:$0xff]  }
  0x38   :  { %349 = vmatprep.subr.bf16.mxu0 %v516_v0  ;;  %365 = vmatprep.mubr.msk.bf16.mxu0 %vm517_vm0, %v516_v0  ;;  %v401_v3 = vld [vmem:[#allocation5 + $0x10] sm:$0xff]   ;;  %v407_v4 = vld [vmem:[#allocation7] sm:$0xff]   ;;  %v402_v5 = vld [vmem:[#allocation5 + $0x18] sm:$0xff]   ;;  %s518_s9 = smov [#allocation8]  }
  0x39   :  { %369 = vmatprep.subr.bf16.mxu1 %v516_v0  ;;  %385 = vmatprep.mubr.msk.bf16.mxu1 %vm517_vm0, %v516_v0  ;;  %v408_v6 = vld [vmem:[#allocation7 + $0x8] sm:$0xff]   ;;  %v403_v7 = vld [vmem:[#allocation5 + $0x20] sm:$0xff]   ;;  %v409_v8 = vld [vmem:[#allocation7 + $0x10] sm:$0xff]   ;;  %s300_s10 = sshll.u32 %s518_s9, 4  ;;  %s301_s10 = int_to_ptr.vmem [resolvable:$true] %s300_s10 }
  0x3a   :  { %350 = vmatpush3.bf16.msra.mxu0 %v399_v1  ;;  %370 = vmatpush3.bf16.msra.mxu1 %v407_v4  ;;  %v404_v9 = vld [vmem:[#allocation5 + $0x28] sm:$0xff]   ;;  %v410_v10 = vld [vmem:[#allocation7 + $0x18] sm:$0xff]   ;;  %v405_v11 = vld [vmem:[#allocation5 + $0x30] sm:$0xff]   ;;  %p486_p11 = scmp.lt.s32.totalorder %s301_s10, %s301_s10 }
  0x3b   :  { %351 = vmatprep.subr.bf16.mxu0 %v516_v0  ;;  %371 = vmatprep.subr.bf16.mxu1 %v516_v0  ;;  %v411_v12 = vld [vmem:[#allocation7 + $0x20] sm:$0xff]   ;;  %v406_v13 = vld [vmem:[#allocation5 + $0x38] sm:$0xff]   ;;  %v63_v14 = vld [vmem:[#allocation2] sm:$0xff] }
  0x3c   :  { %v64_v15 = vld [vmem:[#allocation2 + $0x8] sm:$0xff]  ;;  %v412_v16 = vld [vmem:[#allocation7 + $0x28] sm:$0xff]   ;;  %v413_v18 = vld [vmem:[#allocation7 + $0x30] sm:$0xff]  }
  0x3d   :  { %v65_v17 = vpack.c.bf16 %v64_v15, %v63_v14  ;;  %v414_v19 = vld [vmem:[#allocation7 + $0x38] sm:$0xff]   ;;  %v313_v20 = vld [vmem:[%s617_s2] ss:$0 sm:$0xff]  ;;  %s481_s2 = scalar_lea.vmem %s301_s10, 256 }
  0x3e   :  { %352 = vmatpush3.bf16.msra.mxu0 %v400_v2  ;;  %372 = vmatpush3.bf16.msra.mxu1 %v408_v6  ;;  %v322_v30 = vld [vmem:[%s619_s4] ss:$0 sm:$0xff]  ;;  %p482_p10 = scmp.ne.s32.totalorder %s301_s10, %s481_s2  ;;  %p487_p12 = scmp.lt.s32.totalorder %s481_s2, %s481_s2 }
  0x3f   :  { %353 = vmatprep.subr.bf16.mxu0 %v516_v0  ;;  %373 = vmatprep.subr.bf16.mxu1 %v516_v0 }
  0x40   :  { %p488_p13 = por %p487_p12, %p486_p11 }
  0x42   :  { %354 = vmatpush3.bf16.msra.mxu0 %v401_v3  ;;  %374 = vmatpush3.bf16.msra.mxu1 %v409_v8  ;;  %p489_p0 = pnand %p488_p13, %p482_p10 }
  0x43   :  { %355 = vmatprep.subr.bf16.mxu0 %v516_v0  ;;  %375 = vmatprep.subr.bf16.mxu1 %v516_v0 }
  0x46   :  { %356 = vmatpush3.bf16.msra.mxu0 %v402_v5  ;;  %376 = vmatpush3.bf16.msra.mxu1 %v410_v10 }
  0x47   :  { %357 = vmatprep.subr.bf16.mxu0 %v516_v0  ;;  %377 = vmatprep.subr.bf16.mxu1 %v516_v0 }
  0x4a   :  { %358 = vmatpush3.bf16.msra.mxu0 %v403_v7  ;;  %378 = vmatpush3.bf16.msra.mxu1 %v411_v12 }
  0x4b   :  { %359 = vmatprep.subr.bf16.mxu0 %v516_v0  ;;  %379 = vmatprep.subr.bf16.mxu1 %v516_v0 }
  0x4e   :  { %360 = vmatpush3.bf16.msra.mxu0 %v404_v9  ;;  %380 = vmatpush3.bf16.msra.mxu1 %v412_v16 }
  0x4f   :  { %361 = vmatprep.subr.bf16.mxu0 %v516_v0  ;;  %381 = vmatprep.subr.bf16.mxu1 %v516_v0 }
  0x52   :  { %362 = vmatpush3.bf16.msra.mxu0 %v405_v11  ;;  %382 = vmatpush3.bf16.msra.mxu1 %v413_v18 }
  0x53   :  { %363 = vmatprep.subr.bf16.mxu0 %v516_v0  ;;  %383 = vmatprep.subr.bf16.mxu1 %v516_v0 }
  0x56   :  { %364 = vmatpush3.bf16.msra.mxu0 %v406_v13  ;;  %384 = vmatpush3.bf16.msra.mxu1 %v414_v19 }
  0x59   :  { %366 = vmatmul.mubr.bf16.vlgmr.msra.gmra.mrb[0].mxu0 %v65_v17 }
 0x12c   :  { %v171_v21 = vpop.f32.mrb[0].mxu0 }
 0x12d   :  { %v172_v22 = vadd.f32 %v313_v20, %v171_v21  ;;  %v367_v23 = vpop.f32.mrb[1].mxu0 }
 0x12e   :  { %v174_v24 = vpop.f32.mrb[2].mxu0 }
 0x12f   :  { %v175_v25 = vadd.f32 %v313_v20, %v174_v24  ;;  %v368_v26 = vpop.f32.mrb[3].mxu0  ;;  %v178_v27 = vmax.f32 %v172_v22, 0.0 }
 0x131   :  { %v179_v28 = vmax.f32 %v175_v25, 0.0 }
 0x133   :  { %v180_v29 = vpack.c.bf16 %v179_v28, %v178_v27 }
 0x135   :  { %386 = vmatmul.mubr.bf16.vlgmr.msra.gmra.mrb[0].mxu1 %v180_v29 }
 0x208   :  { %v286_v31 = vpop.f32.mrb[0].mxu1 }
 0x209   :  { %v287_v32 = vadd.f32 %v322_v30, %v286_v31  ;;  %v387_v33 = vpop.f32.mrb[1].mxu1 }
 0x20a   :  { %v289_v34 = vpop.f32.mrb[2].mxu1 }
 0x20b   :  { %293 = vst [vmem:[#allocation8] sm:$0xff] %v287_v32  ;;  %v290_v35 = vadd.f32 %v322_v30, %v289_v34  ;;  %v388_v36 = vpop.f32.mrb[3].mxu1 }
 0x20d   :  { %294 = vst [vmem:[#allocation8 + $0x8] sm:$0xff] %v290_v35 }
 0x20e   :  { %492 = shalt.err (!%p489_p0)
}
 0x20f   :  { %s493_s12 = scalar_lea.hbm %s620_s5, 256 }
 0x210   :  { %p494_p1 = scmp.ne.s32.totalorder %s620_s5, %s493_s12  ;;  %p497_p2 = scmp.lt.u32.totalorder %s493_s12, %s620_s5 }
 0x212   :  { %p499_p3 = pnand %p497_p2, %p494_p1 }
 0x214   :  { %502 = shalt.err (!%p499_p3)
}
 0x215   :  { %306 = dma.vmem_to_hbm [thread:$0]  %s301_s10, 256, %s620_s5, [#allocation4], %s513_s1, %s513_s1, %s514_s17  }
 0x216   :  { %507 = dma.done.wait [#allocation4], 256  }
 0x217   :  { %508 = vsyncadd [#allocation4], 4294967040 }
 0x218   :  { %310 = vsyncpa [#allocation3], 1 }
 0x219   :  { %311 = vsyncpa [#allocation6], 1 }
 0x21a   :  { %312 = vsyncpa [#allocation4], 1 }

</bundles_post_ra>
